<compile_context>
chip_gen: v6e
topology: v6e:2x2x1
jax: 0.10.0
libtpu: 0.0.40
codegen_flags: <defaults>
</compile_context>

<pallas_src>
import jax
import jax.numpy as jnp
from jax.experimental import pallas as pl
from jax.experimental.pallas import tpu as pltpu


# ----------------------------------------------------------------------------
# Shape helpers
# ----------------------------------------------------------------------------
def _pick_lanes(n: int, itemsize: int):
    """Largest lane width (multiple of 128) dividing n, preferring widths that
    still leave rows >= the dtype's sublane packing (8 f32 / 16 bf16 / 32 i8)."""
    min_rows = max(8, 32 // max(1, itemsize))
    best = None
    for lanes in (8192, 4096, 2048, 1024, 512, 256, 128):
        if n % lanes:
            continue
        if best is None:
            best = lanes                   # largest divisor as last resort
        if n // lanes >= min_rows:
            return lanes                   # largest divisor with enough rows
    return best


# ----------------------------------------------------------------------------
# Primary path: direct HBM -> HBM chunked DMA copy (no VMEM staging)
# ----------------------------------------------------------------------------
_MAX_DMA_CHUNKS = 8


def _hbm_dma_copy(xw: jax.Array) -> jax.Array:
    """Copy xw to a fresh buffer via <=8 concurrent HBM->HBM DMAs."""
    work_shape = xw.shape
    ndim = len(work_shape)
    axis0 = work_shape[0]

    # Static chunking of the leading axis; all chunks started, then all waited.
    num_chunks = max(1, min(_MAX_DMA_CHUNKS, axis0))
    base, rem = divmod(axis0, num_chunks)
    chunks = []
    start = 0
    for i in range(num_chunks):
        size = base + (1 if i < rem else 0)
        if size > 0:
            chunks.append((start, size))
        start += size

    def dma_copy_kernel(x_ref, o_ref, sems):
        copies = []
        for i, (s, sz) in enumerate(chunks):
            if ndim == 2:
                src = x_ref.at[pl.ds(s, sz), :]
                dst = o_ref.at[pl.ds(s, sz), :]
            else:
                src = x_ref.at[pl.ds(s, sz)]
                dst = o_ref.at[pl.ds(s, sz)]
            cp = pltpu.make_async_copy(src, dst, sems.at[i])
            cp.start()
            copies.append(cp)
        for cp in copies:
            cp.wait()

    nbytes = int(xw.size) * jnp.dtype(xw.dtype).itemsize
    return pl.pallas_call(
        dma_copy_kernel,
        out_shape=jax.ShapeDtypeStruct(work_shape, xw.dtype),
        in_specs=[pl.BlockSpec(memory_space=pl.ANY)],
        out_specs=pl.BlockSpec(memory_space=pl.ANY),
        scratch_shapes=[pltpu.SemaphoreType.DMA((len(chunks),))],
        cost_estimate=pl.CostEstimate(
            flops=0, transcendentals=0, bytes_accessed=2 * nbytes),
    )(xw)


# ----------------------------------------------------------------------------
# Fallback path: lane-dense, pipelined VMEM copy (only if DMA path fails)
# ----------------------------------------------------------------------------
def _copy_kernel(x_ref, o_ref):
    o_ref[...] = x_ref[...]


def _vmem_tiled_copy(x2d: jax.Array) -> jax.Array:
    rows, lanes = x2d.shape
    itemsize = jnp.dtype(x2d.dtype).itemsize
    sublane = max(8, 32 // max(1, itemsize))           # dtype sublane packing
    target_rows = max(1, (4 * 1024 * 1024) // (lanes * itemsize))  # ~4 MiB tile
    if rows <= max(sublane, target_rows):
        tile_rows = rows
    else:
        tile_rows = max(sublane, (min(rows, target_rows) // sublane) * sublane)

    return pl.pallas_call(
        _copy_kernel,
        out_shape=jax.ShapeDtypeStruct((rows, lanes), x2d.dtype),
        grid=(pl.cdiv(rows, tile_rows),),
        in_specs=[pl.BlockSpec((tile_rows, lanes), lambda i: (i, 0))],
        out_specs=pl.BlockSpec((tile_rows, lanes), lambda i: (i, 0)),
        compiler_params=pltpu.CompilerParams(
            dimension_semantics=("parallel",),
            vmem_limit_bytes=40 * 1024 * 1024,
        ),
    )(x2d)


# ----------------------------------------------------------------------------
# Public API
# ----------------------------------------------------------------------------
def identity_copy_pallas(x: jax.Array) -> jax.Array:
    """Materializing identity copy via HBM->HBM DMA (VMEM copy as fallback)."""
    orig_shape = x.shape
    n = int(x.size)
    if n == 0:
        return x

    itemsize = jnp.dtype(x.dtype).itemsize
    lanes = _pick_lanes(n, itemsize)
    if lanes is not None:
        work_shape = (n // lanes, lanes)
    else:
        # Not a multiple of 128: fine for the DMA path (no VMEM tiling rules).
        work_shape = (n,)
    xw = x.reshape(work_shape)

    try:
        out = _hbm_dma_copy(xw)
    except Exception:
        # TODO(synk): fallback uses a (1, n) single VMEM block when n is not a
        # multiple of 128; acceptable only because this path is never expected.
        x2d = xw if len(work_shape) == 2 else xw.reshape(1, n)
        out = _vmem_tiled_copy(x2d)

    return out.reshape(orig_shape)


def attention_forward(x: jax.Array, materialize: bool = False) -> jax.Array:
    """Pallas equivalent of Attention(name=None).forward(x) == Identity.

    Default (materialize=False): return x unchanged — no HBM traffic, no
    kernel launch (the module is a pure pass-through).  materialize=True
    forces a fresh buffer via the HBM->HBM DMA copy kernel.
    """
    if not materialize:
        return x
    return identity_copy_pallas(x)


if __name__ == "__main__":
    key = jax.random.PRNGKey(0)
    # Small NCHW input consistent with the module's forward (any tensor).
    x = jax.random.normal(key, (2, 4, 16, 16), dtype=jnp.float32)

    # Module-faithful fast path: Identity -> no kernel, no data movement.
    y_fast = attention_forward(x)
    y_fast = jax.block_until_ready(y_fast)
    assert y_fast.shape == x.shape and y_fast.dtype == x.dtype
    assert bool(jnp.all(y_fast == x))

    # Exercise the materializing Pallas copy kernel once.
    y = attention_forward(x, materialize=True)
    y = jax.block_until_ready(y)

    assert y.shape == x.shape and y.dtype == x.dtype
    assert bool(jnp.all(y == x))

    print("KERNEL_OK")
</pallas_src>

<mosaic_0001>
module attributes {stable_mosaic.version = 11 : i64} {
  func.func @dma_copy_kernel(%arg0: memref<8x256xf32, #tpu.memory_space<any>>, %arg1: memref<8x256xf32, #tpu.memory_space<any>>, %arg2: memref<8x!tpu.dma_semaphore, #tpu.memory_space<semaphore_mem>>) attributes {dimension_semantics = [], scalar_prefetch = 0 : i64, scratch_operands = 1 : i64, tpu.core_type = #tpu.core_type<tc>} {
    %c0_i32 = arith.constant 0 : i32
    %c0_i32_0 = arith.constant 0 : i32
    %c0_i32_1 = arith.constant 0 : i32
    %0 = tpu.memref_slice %arg0[%c0_i32_0, %c0_i32_1] : memref<8x256xf32, #tpu.memory_space<any>> -> memref<1x256xf32, #tpu.memory_space<any>>
    %c0_i32_2 = arith.constant 0 : i32
    %c0_i32_3 = arith.constant 0 : i32
    %1 = tpu.memref_slice %arg1[%c0_i32_2, %c0_i32_3] : memref<8x256xf32, #tpu.memory_space<any>> -> memref<1x256xf32, #tpu.memory_space<any>>
    %2 = tpu.memref_slice %arg2[%c0_i32] : memref<8x!tpu.dma_semaphore, #tpu.memory_space<semaphore_mem>> -> memref<1x!tpu.dma_semaphore, #tpu.memory_space<semaphore_mem>>
    %3 = tpu.memref_squeeze %2 : memref<1x!tpu.dma_semaphore, #tpu.memory_space<semaphore_mem>> -> memref<!tpu.dma_semaphore, #tpu.memory_space<semaphore_mem>>
    tpu.enqueue_dma source(%0 : memref<1x256xf32, #tpu.memory_space<any>>) target(%1 : memref<1x256xf32, #tpu.memory_space<any>>) target_semaphore(%3 : memref<!tpu.dma_semaphore, #tpu.memory_space<semaphore_mem>>)
    %c1_i32 = arith.constant 1 : i32
    %c1_i32_4 = arith.constant 1 : i32
    %c0_i32_5 = arith.constant 0 : i32
    %4 = tpu.memref_slice %arg0[%c1_i32_4, %c0_i32_5] : memref<8x256xf32, #tpu.memory_space<any>> -> memref<1x256xf32, #tpu.memory_space<any>>
    %c1_i32_6 = arith.constant 1 : i32
    %c0_i32_7 = arith.constant 0 : i32
    %5 = tpu.memref_slice %arg1[%c1_i32_6, %c0_i32_7] : memref<8x256xf32, #tpu.memory_space<any>> -> memref<1x256xf32, #tpu.memory_space<any>>
    %6 = tpu.memref_slice %arg2[%c1_i32] : memref<8x!tpu.dma_semaphore, #tpu.memory_space<semaphore_mem>> -> memref<1x!tpu.dma_semaphore, #tpu.memory_space<semaphore_mem>>
    %7 = tpu.memref_squeeze %6 : memref<1x!tpu.dma_semaphore, #tpu.memory_space<semaphore_mem>> -> memref<!tpu.dma_semaphore, #tpu.memory_space<semaphore_mem>>
    tpu.enqueue_dma source(%4 : memref<1x256xf32, #tpu.memory_space<any>>) target(%5 : memref<1x256xf32, #tpu.memory_space<any>>) target_semaphore(%7 : memref<!tpu.dma_semaphore, #tpu.memory_space<semaphore_mem>>)
    %c2_i32 = arith.constant 2 : i32
    %c2_i32_8 = arith.constant 2 : i32
    %c0_i32_9 = arith.constant 0 : i32
    %8 = tpu.memref_slice %arg0[%c2_i32_8, %c0_i32_9] : memref<8x256xf32, #tpu.memory_space<any>> -> memref<1x256xf32, #tpu.memory_space<any>>
    %c2_i32_10 = arith.constant 2 : i32
    %c0_i32_11 = arith.constant 0 : i32
    %9 = tpu.memref_slice %arg1[%c2_i32_10, %c0_i32_11] : memref<8x256xf32, #tpu.memory_space<any>> -> memref<1x256xf32, #tpu.memory_space<any>>
    %10 = tpu.memref_slice %arg2[%c2_i32] : memref<8x!tpu.dma_semaphore, #tpu.memory_space<semaphore_mem>> -> memref<1x!tpu.dma_semaphore, #tpu.memory_space<semaphore_mem>>
    %11 = tpu.memref_squeeze %10 : memref<1x!tpu.dma_semaphore, #tpu.memory_space<semaphore_mem>> -> memref<!tpu.dma_semaphore, #tpu.memory_space<semaphore_mem>>
    tpu.enqueue_dma source(%8 : memref<1x256xf32, #tpu.memory_space<any>>) target(%9 : memref<1x256xf32, #tpu.memory_space<any>>) target_semaphore(%11 : memref<!tpu.dma_semaphore, #tpu.memory_space<semaphore_mem>>)
    %c3_i32 = arith.constant 3 : i32
    %c3_i32_12 = arith.constant 3 : i32
    %c0_i32_13 = arith.constant 0 : i32
    %12 = tpu.memref_slice %arg0[%c3_i32_12, %c0_i32_13] : memref<8x256xf32, #tpu.memory_space<any>> -> memref<1x256xf32, #tpu.memory_space<any>>
    %c3_i32_14 = arith.constant 3 : i32
    %c0_i32_15 = arith.constant 0 : i32
    %13 = tpu.memref_slice %arg1[%c3_i32_14, %c0_i32_15] : memref<8x256xf32, #tpu.memory_space<any>> -> memref<1x256xf32, #tpu.memory_space<any>>
    %14 = tpu.memref_slice %arg2[%c3_i32] : memref<8x!tpu.dma_semaphore, #tpu.memory_space<semaphore_mem>> -> memref<1x!tpu.dma_semaphore, #tpu.memory_space<semaphore_mem>>
    %15 = tpu.memref_squeeze %14 : memref<1x!tpu.dma_semaphore, #tpu.memory_space<semaphore_mem>> -> memref<!tpu.dma_semaphore, #tpu.memory_space<semaphore_mem>>
    tpu.enqueue_dma source(%12 : memref<1x256xf32, #tpu.memory_space<any>>) target(%13 : memref<1x256xf32, #tpu.memory_space<any>>) target_semaphore(%15 : memref<!tpu.dma_semaphore, #tpu.memory_space<semaphore_mem>>)
    %c4_i32 = arith.constant 4 : i32
    %c4_i32_16 = arith.constant 4 : i32
    %c0_i32_17 = arith.constant 0 : i32
    %16 = tpu.memref_slice %arg0[%c4_i32_16, %c0_i32_17] : memref<8x256xf32, #tpu.memory_space<any>> -> memref<1x256xf32, #tpu.memory_space<any>>
    %c4_i32_18 = arith.constant 4 : i32
    %c0_i32_19 = arith.constant 0 : i32
    %17 = tpu.memref_slice %arg1[%c4_i32_18, %c0_i32_19] : memref<8x256xf32, #tpu.memory_space<any>> -> memref<1x256xf32, #tpu.memory_space<any>>
    %18 = tpu.memref_slice %arg2[%c4_i32] : memref<8x!tpu.dma_semaphore, #tpu.memory_space<semaphore_mem>> -> memref<1x!tpu.dma_semaphore, #tpu.memory_space<semaphore_mem>>
    %19 = tpu.memref_squeeze %18 : memref<1x!tpu.dma_semaphore, #tpu.memory_space<semaphore_mem>> -> memref<!tpu.dma_semaphore, #tpu.memory_space<semaphore_mem>>
    tpu.enqueue_dma source(%16 : memref<1x256xf32, #tpu.memory_space<any>>) target(%17 : memref<1x256xf32, #tpu.memory_space<any>>) target_semaphore(%19 : memref<!tpu.dma_semaphore, #tpu.memory_space<semaphore_mem>>)
    %c5_i32 = arith.constant 5 : i32
    %c5_i32_20 = arith.constant 5 : i32
    %c0_i32_21 = arith.constant 0 : i32
    %20 = tpu.memref_slice %arg0[%c5_i32_20, %c0_i32_21] : memref<8x256xf32, #tpu.memory_space<any>> -> memref<1x256xf32, #tpu.memory_space<any>>
    %c5_i32_22 = arith.constant 5 : i32
    %c0_i32_23 = arith.constant 0 : i32
    %21 = tpu.memref_slice %arg1[%c5_i32_22, %c0_i32_23] : memref<8x256xf32, #tpu.memory_space<any>> -> memref<1x256xf32, #tpu.memory_space<any>>
    %22 = tpu.memref_slice %arg2[%c5_i32] : memref<8x!tpu.dma_semaphore, #tpu.memory_space<semaphore_mem>> -> memref<1x!tpu.dma_semaphore, #tpu.memory_space<semaphore_mem>>
    %23 = tpu.memref_squeeze %22 : memref<1x!tpu.dma_semaphore, #tpu.memory_space<semaphore_mem>> -> memref<!tpu.dma_semaphore, #tpu.memory_space<semaphore_mem>>
    tpu.enqueue_dma source(%20 : memref<1x256xf32, #tpu.memory_space<any>>) target(%21 : memref<1x256xf32, #tpu.memory_space<any>>) target_semaphore(%23 : memref<!tpu.dma_semaphore, #tpu.memory_space<semaphore_mem>>)
    %c6_i32 = arith.constant 6 : i32
    %c6_i32_24 = arith.constant 6 : i32
    %c0_i32_25 = arith.constant 0 : i32
    %24 = tpu.memref_slice %arg0[%c6_i32_24, %c0_i32_25] : memref<8x256xf32, #tpu.memory_space<any>> -> memref<1x256xf32, #tpu.memory_space<any>>
    %c6_i32_26 = arith.constant 6 : i32
    %c0_i32_27 = arith.constant 0 : i32
    %25 = tpu.memref_slice %arg1[%c6_i32_26, %c0_i32_27] : memref<8x256xf32, #tpu.memory_space<any>> -> memref<1x256xf32, #tpu.memory_space<any>>
    %26 = tpu.memref_slice %arg2[%c6_i32] : memref<8x!tpu.dma_semaphore, #tpu.memory_space<semaphore_mem>> -> memref<1x!tpu.dma_semaphore, #tpu.memory_space<semaphore_mem>>
    %27 = tpu.memref_squeeze %26 : memref<1x!tpu.dma_semaphore, #tpu.memory_space<semaphore_mem>> -> memref<!tpu.dma_semaphore, #tpu.memory_space<semaphore_mem>>
    tpu.enqueue_dma source(%24 : memref<1x256xf32, #tpu.memory_space<any>>) target(%25 : memref<1x256xf32, #tpu.memory_space<any>>) target_semaphore(%27 : memref<!tpu.dma_semaphore, #tpu.memory_space<semaphore_mem>>)
    %c7_i32 = arith.constant 7 : i32
    %c7_i32_28 = arith.constant 7 : i32
    %c0_i32_29 = arith.constant 0 : i32
    %28 = tpu.memref_slice %arg0[%c7_i32_28, %c0_i32_29] : memref<8x256xf32, #tpu.memory_space<any>> -> memref<1x256xf32, #tpu.memory_space<any>>
    %c7_i32_30 = arith.constant 7 : i32
    %c0_i32_31 = arith.constant 0 : i32
    %29 = tpu.memref_slice %arg1[%c7_i32_30, %c0_i32_31] : memref<8x256xf32, #tpu.memory_space<any>> -> memref<1x256xf32, #tpu.memory_space<any>>
    %30 = tpu.memref_slice %arg2[%c7_i32] : memref<8x!tpu.dma_semaphore, #tpu.memory_space<semaphore_mem>> -> memref<1x!tpu.dma_semaphore, #tpu.memory_space<semaphore_mem>>
    %31 = tpu.memref_squeeze %30 : memref<1x!tpu.dma_semaphore, #tpu.memory_space<semaphore_mem>> -> memref<!tpu.dma_semaphore, #tpu.memory_space<semaphore_mem>>
    tpu.enqueue_dma source(%28 : memref<1x256xf32, #tpu.memory_space<any>>) target(%29 : memref<1x256xf32, #tpu.memory_space<any>>) target_semaphore(%31 : memref<!tpu.dma_semaphore, #tpu.memory_space<semaphore_mem>>)
    %c0_i32_32 = arith.constant 0 : i32
    %c0_i32_33 = arith.constant 0 : i32
    %c0_i32_34 = arith.constant 0 : i32
    %32 = tpu.memref_slice %arg0[%c0_i32_33, %c0_i32_34] : memref<8x256xf32, #tpu.memory_space<any>> -> memref<1x256xf32, #tpu.memory_space<any>>
    %c0_i32_35 = arith.constant 0 : i32
    %c0_i32_36 = arith.constant 0 : i32
    %33 = tpu.memref_slice %arg1[%c0_i32_35, %c0_i32_36] : memref<8x256xf32, #tpu.memory_space<any>> -> memref<1x256xf32, #tpu.memory_space<any>>
    %34 = tpu.memref_slice %arg2[%c0_i32_32] : memref<8x!tpu.dma_semaphore, #tpu.memory_space<semaphore_mem>> -> memref<1x!tpu.dma_semaphore, #tpu.memory_space<semaphore_mem>>
    %35 = tpu.memref_squeeze %34 : memref<1x!tpu.dma_semaphore, #tpu.memory_space<semaphore_mem>> -> memref<!tpu.dma_semaphore, #tpu.memory_space<semaphore_mem>>
    tpu.wait_dma2 semaphore(%35 : memref<!tpu.dma_semaphore, #tpu.memory_space<semaphore_mem>>) src(%32 : memref<1x256xf32, #tpu.memory_space<any>>) dst(%33 : memref<1x256xf32, #tpu.memory_space<any>>)
    %c1_i32_37 = arith.constant 1 : i32
    %c1_i32_38 = arith.constant 1 : i32
    %c0_i32_39 = arith.constant 0 : i32
    %36 = tpu.memref_slice %arg0[%c1_i32_38, %c0_i32_39] : memref<8x256xf32, #tpu.memory_space<any>> -> memref<1x256xf32, #tpu.memory_space<any>>
    %c1_i32_40 = arith.constant 1 : i32
    %c0_i32_41 = arith.constant 0 : i32
    %37 = tpu.memref_slice %arg1[%c1_i32_40, %c0_i32_41] : memref<8x256xf32, #tpu.memory_space<any>> -> memref<1x256xf32, #tpu.memory_space<any>>
    %38 = tpu.memref_slice %arg2[%c1_i32_37] : memref<8x!tpu.dma_semaphore, #tpu.memory_space<semaphore_mem>> -> memref<1x!tpu.dma_semaphore, #tpu.memory_space<semaphore_mem>>
    %39 = tpu.memref_squeeze %38 : memref<1x!tpu.dma_semaphore, #tpu.memory_space<semaphore_mem>> -> memref<!tpu.dma_semaphore, #tpu.memory_space<semaphore_mem>>
    tpu.wait_dma2 semaphore(%39 : memref<!tpu.dma_semaphore, #tpu.memory_space<semaphore_mem>>) src(%36 : memref<1x256xf32, #tpu.memory_space<any>>) dst(%37 : memref<1x256xf32, #tpu.memory_space<any>>)
    %c2_i32_42 = arith.constant 2 : i32
    %c2_i32_43 = arith.constant 2 : i32
    %c0_i32_44 = arith.constant 0 : i32
    %40 = tpu.memref_slice %arg0[%c2_i32_43, %c0_i32_44] : memref<8x256xf32, #tpu.memory_space<any>> -> memref<1x256xf32, #tpu.memory_space<any>>
    %c2_i32_45 = arith.constant 2 : i32
    %c0_i32_46 = arith.constant 0 : i32
    %41 = tpu.memref_slice %arg1[%c2_i32_45, %c0_i32_46] : memref<8x256xf32, #tpu.memory_space<any>> -> memref<1x256xf32, #tpu.memory_space<any>>
    %42 = tpu.memref_slice %arg2[%c2_i32_42] : memref<8x!tpu.dma_semaphore, #tpu.memory_space<semaphore_mem>> -> memref<1x!tpu.dma_semaphore, #tpu.memory_space<semaphore_mem>>
    %43 = tpu.memref_squeeze %42 : memref<1x!tpu.dma_semaphore, #tpu.memory_space<semaphore_mem>> -> memref<!tpu.dma_semaphore, #tpu.memory_space<semaphore_mem>>
    tpu.wait_dma2 semaphore(%43 : memref<!tpu.dma_semaphore, #tpu.memory_space<semaphore_mem>>) src(%40 : memref<1x256xf32, #tpu.memory_space<any>>) dst(%41 : memref<1x256xf32, #tpu.memory_space<any>>)
    %c3_i32_47 = arith.constant 3 : i32
    %c3_i32_48 = arith.constant 3 : i32
    %c0_i32_49 = arith.constant 0 : i32
    %44 = tpu.memref_slice %arg0[%c3_i32_48, %c0_i32_49] : memref<8x256xf32, #tpu.memory_space<any>> -> memref<1x256xf32, #tpu.memory_space<any>>
    %c3_i32_50 = arith.constant 3 : i32
    %c0_i32_51 = arith.constant 0 : i32
    %45 = tpu.memref_slice %arg1[%c3_i32_50, %c0_i32_51] : memref<8x256xf32, #tpu.memory_space<any>> -> memref<1x256xf32, #tpu.memory_space<any>>
    %46 = tpu.memref_slice %arg2[%c3_i32_47] : memref<8x!tpu.dma_semaphore, #tpu.memory_space<semaphore_mem>> -> memref<1x!tpu.dma_semaphore, #tpu.memory_space<semaphore_mem>>
    %47 = tpu.memref_squeeze %46 : memref<1x!tpu.dma_semaphore, #tpu.memory_space<semaphore_mem>> -> memref<!tpu.dma_semaphore, #tpu.memory_space<semaphore_mem>>
    tpu.wait_dma2 semaphore(%47 : memref<!tpu.dma_semaphore, #tpu.memory_space<semaphore_mem>>) src(%44 : memref<1x256xf32, #tpu.memory_space<any>>) dst(%45 : memref<1x256xf32, #tpu.memory_space<any>>)
    %c4_i32_52 = arith.constant 4 : i32
    %c4_i32_53 = arith.constant 4 : i32
    %c0_i32_54 = arith.constant 0 : i32
    %48 = tpu.memref_slice %arg0[%c4_i32_53, %c0_i32_54] : memref<8x256xf32, #tpu.memory_space<any>> -> memref<1x256xf32, #tpu.memory_space<any>>
    %c4_i32_55 = arith.constant 4 : i32
    %c0_i32_56 = arith.constant 0 : i32
    %49 = tpu.memref_slice %arg1[%c4_i32_55, %c0_i32_56] : memref<8x256xf32, #tpu.memory_space<any>> -> memref<1x256xf32, #tpu.memory_space<any>>
    %50 = tpu.memref_slice %arg2[%c4_i32_52] : memref<8x!tpu.dma_semaphore, #tpu.memory_space<semaphore_mem>> -> memref<1x!tpu.dma_semaphore, #tpu.memory_space<semaphore_mem>>
    %51 = tpu.memref_squeeze %50 : memref<1x!tpu.dma_semaphore, #tpu.memory_space<semaphore_mem>> -> memref<!tpu.dma_semaphore, #tpu.memory_space<semaphore_mem>>
    tpu.wait_dma2 semaphore(%51 : memref<!tpu.dma_semaphore, #tpu.memory_space<semaphore_mem>>) src(%48 : memref<1x256xf32, #tpu.memory_space<any>>) dst(%49 : memref<1x256xf32, #tpu.memory_space<any>>)
    %c5_i32_57 = arith.constant 5 : i32
    %c5_i32_58 = arith.constant 5 : i32
    %c0_i32_59 = arith.constant 0 : i32
    %52 = tpu.memref_slice %arg0[%c5_i32_58, %c0_i32_59] : memref<8x256xf32, #tpu.memory_space<any>> -> memref<1x256xf32, #tpu.memory_space<any>>
    %c5_i32_60 = arith.constant 5 : i32
    %c0_i32_61 = arith.constant 0 : i32
    %53 = tpu.memref_slice %arg1[%c5_i32_60, %c0_i32_61] : memref<8x256xf32, #tpu.memory_space<any>> -> memref<1x256xf32, #tpu.memory_space<any>>
    %54 = tpu.memref_slice %arg2[%c5_i32_57] : memref<8x!tpu.dma_semaphore, #tpu.memory_space<semaphore_mem>> -> memref<1x!tpu.dma_semaphore, #tpu.memory_space<semaphore_mem>>
    %55 = tpu.memref_squeeze %54 : memref<1x!tpu.dma_semaphore, #tpu.memory_space<semaphore_mem>> -> memref<!tpu.dma_semaphore, #tpu.memory_space<semaphore_mem>>
    tpu.wait_dma2 semaphore(%55 : memref<!tpu.dma_semaphore, #tpu.memory_space<semaphore_mem>>) src(%52 : memref<1x256xf32, #tpu.memory_space<any>>) dst(%53 : memref<1x256xf32, #tpu.memory_space<any>>)
    %c6_i32_62 = arith.constant 6 : i32
    %c6_i32_63 = arith.constant 6 : i32
    %c0_i32_64 = arith.constant 0 : i32
    %56 = tpu.memref_slice %arg0[%c6_i32_63, %c0_i32_64] : memref<8x256xf32, #tpu.memory_space<any>> -> memref<1x256xf32, #tpu.memory_space<any>>
    %c6_i32_65 = arith.constant 6 : i32
    %c0_i32_66 = arith.constant 0 : i32
    %57 = tpu.memref_slice %arg1[%c6_i32_65, %c0_i32_66] : memref<8x256xf32, #tpu.memory_space<any>> -> memref<1x256xf32, #tpu.memory_space<any>>
    %58 = tpu.memref_slice %arg2[%c6_i32_62] : memref<8x!tpu.dma_semaphore, #tpu.memory_space<semaphore_mem>> -> memref<1x!tpu.dma_semaphore, #tpu.memory_space<semaphore_mem>>
    %59 = tpu.memref_squeeze %58 : memref<1x!tpu.dma_semaphore, #tpu.memory_space<semaphore_mem>> -> memref<!tpu.dma_semaphore, #tpu.memory_space<semaphore_mem>>
    tpu.wait_dma2 semaphore(%59 : memref<!tpu.dma_semaphore, #tpu.memory_space<semaphore_mem>>) src(%56 : memref<1x256xf32, #tpu.memory_space<any>>) dst(%57 : memref<1x256xf32, #tpu.memory_space<any>>)
    %c7_i32_67 = arith.constant 7 : i32
    %c7_i32_68 = arith.constant 7 : i32
    %c0_i32_69 = arith.constant 0 : i32
    %60 = tpu.memref_slice %arg0[%c7_i32_68, %c0_i32_69] : memref<8x256xf32, #tpu.memory_space<any>> -> memref<1x256xf32, #tpu.memory_space<any>>
    %c7_i32_70 = arith.constant 7 : i32
    %c0_i32_71 = arith.constant 0 : i32
    %61 = tpu.memref_slice %arg1[%c7_i32_70, %c0_i32_71] : memref<8x256xf32, #tpu.memory_space<any>> -> memref<1x256xf32, #tpu.memory_space<any>>
    %62 = tpu.memref_slice %arg2[%c7_i32_67] : memref<8x!tpu.dma_semaphore, #tpu.memory_space<semaphore_mem>> -> memref<1x!tpu.dma_semaphore, #tpu.memory_space<semaphore_mem>>
    %63 = tpu.memref_squeeze %62 : memref<1x!tpu.dma_semaphore, #tpu.memory_space<semaphore_mem>> -> memref<!tpu.dma_semaphore, #tpu.memory_space<semaphore_mem>>
    tpu.wait_dma2 semaphore(%63 : memref<!tpu.dma_semaphore, #tpu.memory_space<semaphore_mem>>) src(%60 : memref<1x256xf32, #tpu.memory_space<any>>) dst(%61 : memref<1x256xf32, #tpu.memory_space<any>>)
    return
  }
}

module attributes {stable_mosaic.version = 11 : i64} {
  func.func @_copy_kernel(%arg0: i32, %arg1: memref<8x256xf32, #tpu.memory_space<vmem>>, %arg2: memref<8x256xf32, #tpu.memory_space<vmem>>) attributes {dimension_semantics = [#tpu.dimension_semantics<parallel>], iteration_bounds = array<i64: 1>, scalar_prefetch = 0 : i64, scratch_operands = 0 : i64, tpu.core_type = #tpu.core_type<tc>, window_params = [{transform_indices = @transform_0, window_bounds = array<i64: 8, 256>}, {transform_indices = @transform_1, window_bounds = array<i64: 8, 256>}]} {
    %c0 = arith.constant 0 : index
    %c0_0 = arith.constant 0 : index
    %0 = vector.load %arg1[%c0, %c0_0] : memref<8x256xf32, #tpu.memory_space<vmem>>, vector<8x256xf32>
    %c0_1 = arith.constant 0 : index
    %c0_2 = arith.constant 0 : index
    %1 = vector.load %arg2[%c0_1, %c0_2] : memref<8x256xf32, #tpu.memory_space<vmem>>, vector<8x256xf32>
    tpu.vector_store %arg2[%c0_1, %c0_2], %0 {strides = array<i32>} : memref<8x256xf32, #tpu.memory_space<vmem>>, vector<8x256xf32>,
    return
  }
  func.func @transform_0(%arg0: i32) -> (i32, i32) {
    %c0_i32 = arith.constant 0 : i32
    %c0_i32_0 = arith.constant 0 : i32
    return %arg0, %c0_i32 : i32, i32
  }
  func.func @transform_1(%arg0: i32) -> (i32, i32) {
    %c0_i32 = arith.constant 0 : i32
    %c0_i32_0 = arith.constant 0 : i32
    return %arg0, %c0_i32 : i32, i32
  }
}

</mosaic_0001>

<bundles_post_ra>
// kernel: tpu_custom_call.1
= control target key start
LH: loop header
LB: loop body
LE: loop exit
PB: predicated region body
PF: predicated region fallthrough
CT: control target
= control target key end

     0   :  { %s239_s6 = smov 128   ;;  %s240_s7 = smov 1   ;;  %s349_s0 = inlined_call_operand.hbm [shape: f32[8,256], index: 0, kind: input, shape index: {}]   ;;  %s350_s1 = inlined_call_operand.hbm [shape: f32[8,256], index: 1, kind: output, shape index: {}]  }
   0x1   :  { %12 = sst [smem:[#allocation4]] %s239_s6  ;;  %s241_s8 = smov [#allocation2]  }
   0x2   :  { %14 = sst [smem:[#allocation4 + $0x1]] %s239_s6  ;;  %s242_s9 = smov 131072  }
   0x3   :  { %16 = sst [smem:[#allocation4 + $0x2]] %s240_s7  ;;  %s243_s10 = smov 0  }
   0x4   :  { %18 = dma.general %s349_s0, 32, %s350_s1, %s241_s8, %s242_s9, [#allocation4], %s243_s10, 0  }
   0x5   :  { %28 = sst [smem:[#allocation6]] %s239_s6  ;;  %s19_s17 = scalar_lea.hbm %s349_s0, 16 }
   0x6   :  { %30 = sst [smem:[#allocation6 + $0x1]] %s239_s6  ;;  %s20_s20 = scalar_lea.hbm %s350_s1, 16 }
   0x7   :  { %32 = sst [smem:[#allocation6 + $0x2]] %s240_s7  ;;  %s244_s21 = smov [#allocation2 + $0x1]  }
   0x8   :  { %34 = dma.general %s19_s17, 32, %s20_s20, %s244_s21, %s242_s9, [#allocation6], %s243_s10, 0  }
   0x9   :  { %44 = sst [smem:[#allocation8]] %s239_s6  ;;  %s35_s24 = scalar_lea.hbm %s349_s0, 32 }
   0xa   :  { %46 = sst [smem:[#allocation8 + $0x1]] %s239_s6  ;;  %s36_s27 = scalar_lea.hbm %s350_s1, 32 }
   0xb   :  { %48 = sst [smem:[#allocation8 + $0x2]] %s240_s7  ;;  %s245_s28 = smov [#allocation2 + $0x2]  }
   0xc   :  { %50 = dma.general %s35_s24, 32, %s36_s27, %s245_s28, %s242_s9, [#allocation8], %s243_s10, 0  }
   0xd   :  { %60 = sst [smem:[#allocation10]] %s239_s6  ;;  %s51_s2 = scalar_lea.hbm %s349_s0, 48 }
   0xe   :  { %62 = sst [smem:[#allocation10 + $0x1]] %s239_s6  ;;  %s52_s5 = scalar_lea.hbm %s350_s1, 48 }
   0xf   :  { %64 = sst [smem:[#allocation10 + $0x2]] %s240_s7  ;;  %s246_s8 = smov [#allocation2 + $0x3]  }
  0x10   :  { %66 = dma.general %s51_s2, 32, %s52_s5, %s246_s8, %s242_s9, [#allocation10], %s243_s10, 0  }
  0x11   :  { %76 = sst [smem:[#allocation12]] %s239_s6  ;;  %s67_s13 = scalar_lea.hbm %s349_s0, 64 }
  0x12   :  { %78 = sst [smem:[#allocation12 + $0x1]] %s239_s6  ;;  %s68_s16 = scalar_lea.hbm %s350_s1, 64 }
  0x13   :  { %80 = sst [smem:[#allocation12 + $0x2]] %s240_s7  ;;  %s247_s17 = smov [#allocation2 + $0x4]  }
  0x14   :  { %82 = dma.general %s67_s13, 32, %s68_s16, %s247_s17, %s242_s9, [#allocation12], %s243_s10, 0  }
  0x15   :  { %92 = sst [smem:[#allocation14]] %s239_s6  ;;  %s83_s20 = scalar_lea.hbm %s349_s0, 80 }
  0x16   :  { %94 = sst [smem:[#allocation14 + $0x1]] %s239_s6  ;;  %s84_s23 = scalar_lea.hbm %s350_s1, 80 }
  0x17   :  { %96 = sst [smem:[#allocation14 + $0x2]] %s240_s7  ;;  %s248_s24 = smov [#allocation2 + $0x5]  }
  0x18   :  { %98 = dma.general %s83_s20, 32, %s84_s23, %s248_s24, %s242_s9, [#allocation14], %s243_s10, 0  }
  0x19   :  { %108 = sst [smem:[#allocation16]] %s239_s6  ;;  %s99_s27 = scalar_lea.hbm %s349_s0, 96 }
  0x1a   :  { %110 = sst [smem:[#allocation16 + $0x1]] %s239_s6  ;;  %s100_s30 = scalar_lea.hbm %s350_s1, 96 }
  0x1b   :  { %112 = sst [smem:[#allocation16 + $0x2]] %s240_s7  ;;  %s249_s2 = smov [#allocation2 + $0x6]  }
  0x1c   :  { %114 = dma.general %s99_s27, 32, %s100_s30, %s249_s2, %s242_s9, [#allocation16], %s243_s10, 0  }
  0x1d   :  { %124 = sst [smem:[#allocation18]] %s239_s6  ;;  %s115_s5 = scalar_lea.hbm %s349_s0, 112 }
  0x1e   :  { %126 = sst [smem:[#allocation18 + $0x1]] %s239_s6  ;;  %s116_s12 = scalar_lea.hbm %s350_s1, 112 }
  0x1f   :  { %128 = sst [smem:[#allocation18 + $0x2]] %s240_s7  ;;  %s250_s13 = smov [#allocation2 + $0x7]  }
  0x20   :  { %130 = dma.general %s115_s5, 32, %s116_s12, %s250_s13, %s242_s9, [#allocation18], %s243_s10, 0  }
  0x21   :  { %223 = dma.done.wait [#allocation2], 32 }
  0x22   :  { %224 = vsyncadd [#allocation2], 4294967264 }
  0x23   :  { %225 = dma.done.wait [#allocation2 + $0x1], 32 }
  0x24   :  { %226 = vsyncadd [#allocation2 + $0x1], 4294967264 }
  0x25   :  { %227 = dma.done.wait [#allocation2 + $0x2], 32 }
  0x26   :  { %228 = vsyncadd [#allocation2 + $0x2], 4294967264 }
  0x27   :  { %229 = dma.done.wait [#allocation2 + $0x3], 32 }
  0x28   :  { %230 = vsyncadd [#allocation2 + $0x3], 4294967264 }
  0x29   :  { %231 = dma.done.wait [#allocation2 + $0x4], 32 }
  0x2a   :  { %232 = vsyncadd [#allocation2 + $0x4], 4294967264 }
  0x2b   :  { %233 = dma.done.wait [#allocation2 + $0x5], 32 }
  0x2c   :  { %234 = vsyncadd [#allocation2 + $0x5], 4294967264 }
  0x2d   :  { %235 = dma.done.wait [#allocation2 + $0x6], 32 }
  0x2e   :  { %236 = vsyncadd [#allocation2 + $0x6], 4294967264 }
  0x2f   :  { %237 = dma.done.wait [#allocation2 + $0x7], 32 }
  0x30   :  { %238 = vsyncadd [#allocation2 + $0x7], 4294967264 }
  0x31   :  { %148 = vsyncmov [#allocation2] }
  0x34   :  { %s149_s0 = vpop.sfrf %148 }
  0x35   :  { %p203_p0 = scmp.ne.s32.totalorder %s149_s0, 0 }
  0x37   :  { %153 = shalt.err (%p203_p0)  }
  0x38   :  { %155 = vsyncmov [#allocation2 + $0x1] }
  0x3b   :  { %s156_s1 = vpop.sfrf %155 }
  0x3c   :  { %p204_p1 = scmp.ne.s32.totalorder %s156_s1, 0 }
  0x3e   :  { %160 = shalt.err (%p204_p1)  }
  0x3f   :  { %162 = vsyncmov [#allocation2 + $0x2] }
  0x42   :  { %s163_s6 = vpop.sfrf %162 }
  0x43   :  { %p205_p2 = scmp.ne.s32.totalorder %s163_s6, 0 }
  0x45   :  { %167 = shalt.err (%p205_p2)  }
  0x46   :  { %169 = vsyncmov [#allocation2 + $0x3] }
  0x49   :  { %s170_s7 = vpop.sfrf %169 }
  0x4a   :  { %p206_p3 = scmp.ne.s32.totalorder %s170_s7, 0 }
  0x4c   :  { %174 = shalt.err (%p206_p3)  }
  0x4d   :  { %176 = vsyncmov [#allocation2 + $0x4] }
  0x50   :  { %s177_s9 = vpop.sfrf %176 }
  0x51   :  { %p207_p4 = scmp.ne.s32.totalorder %s177_s9, 0 }
  0x53   :  { %181 = shalt.err (%p207_p4)  }
  0x54   :  { %183 = vsyncmov [#allocation2 + $0x5] }
  0x57   :  { %s184_s10 = vpop.sfrf %183 }
  0x58   :  { %p208_p5 = scmp.ne.s32.totalorder %s184_s10, 0 }
  0x5a   :  { %188 = shalt.err (%p208_p5)  }
  0x5b   :  { %190 = vsyncmov [#allocation2 + $0x6] }
  0x5e   :  { %s191_s14 = vpop.sfrf %190 }
  0x5f   :  { %p209_p6 = scmp.ne.s32.totalorder %s191_s14, 0 }
  0x61   :  { %195 = shalt.err (%p209_p6)  }
  0x62   :  { %197 = vsyncmov [#allocation2 + $0x7] }
  0x65   :  { %s198_s15 = vpop.sfrf %197 }
  0x66   :  { %p210_p7 = scmp.ne.s32.totalorder %s198_s15, 0 }
  0x68   :  { %202 = shalt.err (%p210_p7)  }

// kernel: tpu_custom_call.1
= control target key start
LH: loop header
LB: loop body
LE: loop exit
PB: predicated region body
PF: predicated region fallthrough
CT: control target
= control target key end

     0   :  { %6 = vsyncpa [#allocation3], 0  ;;  %s104_s0 = inlined_call_operand.hbm [shape: f32[8,256], index: 0, kind: input, shape index: {}]   ;;  %s105_s1 = inlined_call_operand.hbm [shape: f32[8,256], index: 1, kind: output, shape index: {}]  }
   0x1   :  { %7 = vsyncpa [#allocation4], 0  ;;  %s86_s6 = smov [#allocation2]  }
   0x2   :  { %s14_s7 = sshll.u32 %s86_s6, 4  ;;  %s15_s7 = int_to_ptr.vmem [resolvable:$true] %s14_s7 }
   0x3   :  { %s50_s8 = scalar_lea.vmem %s15_s7, 256  ;;  %p55_p1 = scmp.lt.s32.totalorder %s15_s7, %s15_s7 }
   0x4   :  { %p51_p0 = scmp.ne.s32.totalorder %s15_s7, %s50_s8  ;;  %p56_p2 = scmp.lt.s32.totalorder %s50_s8, %s50_s8 }
   0x6   :  { %p57_p3 = por %p56_p2, %p55_p1 }
   0x8   :  { %p58_p4 = pnand %p57_p3, %p51_p0 }
   0xa   :  { %61 = shalt.err (!%p58_p4)
}
   0xb   :  { %17 = dma.hbm_to_vmem [thread:$0]  %s104_s0, 256, %s15_s7, [#allocation3]  }
   0xc   :  { %82 = dma.done.wait [#allocation3], 256  }
   0xd   :  { %83 = vsyncadd [#allocation3], 4294967040  ;;  %s87_s11 = smov [#allocation5]   ;;  %v21_v0 = vld [vmem:[#allocation2] sm:$0xff]  ;;  %v22_v1 = vld [vmem:[#allocation2 + $0x8] sm:$0xff] }
   0xe   :  { %s31_s12 = sshll.u32 %s87_s11, 4  ;;  %23 = vst [vmem:[#allocation5] sm:$0xff] %v21_v0  ;;  %24 = vst [vmem:[#allocation5 + $0x8] sm:$0xff] %v22_v1  ;;  %s32_s12 = int_to_ptr.vmem [resolvable:$true] %s31_s12 }
   0xf   :  { %s62_s13 = scalar_lea.vmem %s32_s12, 256  ;;  %p67_p6 = scmp.lt.s32.totalorder %s32_s12, %s32_s12 }
  0x10   :  { %p63_p5 = scmp.ne.s32.totalorder %s32_s12, %s62_s13  ;;  %p68_p7 = scmp.lt.s32.totalorder %s62_s13, %s62_s13 }
  0x12   :  { %p69_p8 = por %p68_p7, %p67_p6 }
  0x14   :  { %p70_p9 = pnand %p69_p8, %p63_p5 }
  0x16   :  { %73 = shalt.err (!%p70_p9)
}
  0x17   :  { %34 = dma.vmem_to_hbm [thread:$0]  %s32_s12, 256, %s105_s1, [#allocation4]  }
  0x18   :  { %84 = dma.done.wait [#allocation4], 256  }
  0x19   :  { %85 = vsyncadd [#allocation4], 4294967040 }
  0x1a   :  { %38 = vsyncpa [#allocation3], 1 }
  0x1b   :  { %39 = vsyncpa [#allocation4], 1 }

</bundles_post_ra>
